<compile_context>
chip_gen: v7x
topology: tpu7x:2x2x1
jax: 0.10.0
libtpu: 0.0.40
codegen_flags: <defaults>
</compile_context>

<pallas_src>
import functools

import jax
import jax.numpy as jnp
from jax.experimental import pallas as pl
from jax.experimental.pallas import tpu as pltpu


def _round_up(n, m):
    return ((n + m - 1) // m) * m


def _actor_kernel(x_ref, w1_ref, b1_ref, w2_ref, b2_ref, o_ref):
    """One batch tile: (folded) Linear -> ReLU -> Linear (bf16 MXU) -> softmax."""
    x = x_ref[...]                                     # (TB, 2) f32

    # Layer 1: K=2 contraction as two VPU broadcast FMAs (no MXU push).
    # The input affine (x * [2, 0.02] - 1) is already folded into w1/b1.
    h = (x[:, 0:1] * w1_ref[0:1, :]
         + x[:, 1:2] * w1_ref[1:2, :]
         + b1_ref[...])                                # (TB, Hp) f32
    h = jnp.maximum(h, 0.0)                            # ReLU

    # Layer 2: (TB, Hp) @ (Hp, Op) in bf16 on the MXU, f32 accumulate.
    logits = jnp.dot(h.astype(jnp.bfloat16), w2_ref[...],
                     preferred_element_type=jnp.float32) + b2_ref[...]

    # Numerically stable softmax.  Padded logit columns carry bias -1e30 so
    # exp() underflows to exactly 0 and they don't perturb max/sum.
    m = jnp.max(logits, axis=-1, keepdims=True)
    e = jnp.exp(logits - m)
    denom = jnp.sum(e, axis=-1, keepdims=True)
    probs = e / denom                                  # exact normalization

    # Store only the real output columns (tiny, lane-masked store).
    o_ref[...] = probs[:, :o_ref.shape[1]]


def prepare_params(w1, b1, w2, b2, *, lane=128):
    """One-time parameter rewrite.

    w1: (2, hsz), b1: (hsz,), w2: (hsz, out), b2: (out,)  [stored as (in, out)].
    Folds the input affine (x * [2, 0.02] - 1) into layer 1, pads hidden/output
    widths to 128 (padded logit columns biased to -1e30), and stores the
    layer-2 weights in bf16 for the MXU.
    """
    w1 = jnp.asarray(w1, jnp.float32)
    b1 = jnp.asarray(b1, jnp.float32).reshape(1, -1)
    w2 = jnp.asarray(w2, jnp.float32)
    b2 = jnp.asarray(b2, jnp.float32).reshape(1, -1)

    hsz = w1.shape[1]
    out_sz = w2.shape[1]
    Hp = _round_up(hsz, lane)
    Op = _round_up(out_sz, lane)

    # Fold: (x*s - 1) @ w1 + b1 == x @ (s[:,None]*w1) + (b1 - sum_rows(w1))
    scale = jnp.array([[2.0], [2.0 / 100.0]], jnp.float32)
    w1f = w1 * scale
    b1f = b1 - jnp.sum(w1, axis=0, keepdims=True)

    w1p = jnp.pad(w1f, ((0, 0), (0, Hp - hsz)))
    b1p = jnp.pad(b1f, ((0, 0), (0, Hp - hsz)))
    w2p = jnp.pad(w2, ((0, Hp - hsz), (0, Op - out_sz))).astype(jnp.bfloat16)
    b2p = jnp.pad(b2, ((0, 0), (0, Op - out_sz)), constant_values=-1e30)
    return w1p, b1p, w2p, b2p, out_sz


@functools.partial(jax.jit, static_argnames=("out_sz", "tb_max"))
def actor_forward(x, w1p, b1p, w2p, b2p, *, out_sz, tb_max=2048):
    x = jnp.asarray(x, jnp.float32)
    B = x.shape[0]
    Hp = w1p.shape[1]
    Op = w2p.shape[1]

    # Batch tile: multiple of 8 (f32 sublanes), capped at tb_max.
    Bp8 = _round_up(B, 8)
    tb = min(tb_max, Bp8)
    # For mid-size batches force >=2 grid steps so the "parallel" batch axis
    # shards across both v7x TensorCores (no effect on single-TC v5e/v6e).
    if 512 <= Bp8 <= 2 * tb_max:
        tb = min(tb, max(256, _round_up(Bp8 // 2, 8)))
    grid = pl.cdiv(Bp8, tb)
    Bp = grid * tb
    if Bp != B:
        x = jnp.pad(x, ((0, Bp - B), (0, 0)))

    out = pl.pallas_call(
        _actor_kernel,
        out_shape=jax.ShapeDtypeStruct((Bp, out_sz), jnp.float32),
        grid=(grid,),
        in_specs=[
            # x streams over the batch; weight blocks use constant index maps
            # so the pipeline fetches them once and keeps them VMEM-resident.
            pl.BlockSpec((tb, 2), lambda i: (i, 0)),   # x
            pl.BlockSpec((2, Hp), lambda i: (0, 0)),   # w1 (folded, padded)
            pl.BlockSpec((1, Hp), lambda i: (0, 0)),   # b1
            pl.BlockSpec((Hp, Op), lambda i: (0, 0)),  # w2 (bf16, padded)
            pl.BlockSpec((1, Op), lambda i: (0, 0)),   # b2 (pad = -1e30, f32)
        ],
        out_specs=pl.BlockSpec((tb, out_sz), lambda i: (i, 0)),
        compiler_params=pltpu.CompilerParams(
            dimension_semantics=("parallel",)),
    )(x, w1p, b1p, w2p, b2p)

    return out[:B] if Bp != B else out


def _ref_forward(x, w1, b1, w2, b2):
    inp = jnp.stack(
        [x[:, 0] * 2.0 - 1.0, x[:, 1] / 100.0 * 2.0 - 1.0], axis=-1)
    h = jnp.maximum(inp @ w1 + b1.reshape(1, -1), 0.0)
    logits = h @ w2 + b2.reshape(1, -1)
    return jax.nn.softmax(logits, axis=-1)


def _check(B, params, out_sz, key):
    w1, b1, w2, b2, w1p, b1p, w2p, b2p = params
    x = jax.random.uniform(key, (B, 2), jnp.float32)
    x = x.at[:, 1].multiply(100.0)   # column 0 ~ [0,1), column 1 ~ [0,100)

    out = actor_forward(x, w1p, b1p, w2p, b2p, out_sz=out_sz)
    out = jax.block_until_ready(out)
    ref = _ref_forward(x, w1, b1, w2, b2)

    assert out.shape == (B, out_sz)
    # Exact normalization -> rows sum to 1 at f32 accuracy.
    assert jnp.allclose(jnp.sum(out, axis=-1), 1.0, atol=1e-5)
    # Layer 2 runs in bf16; allow a loose tolerance vs the f32 reference.
    err = float(jnp.max(jnp.abs(out - ref)))
    assert err < 1e-2, err


if __name__ == "__main__":
    input_sz, hsz, output_sz = 2, 64, 3

    key = jax.random.PRNGKey(0)
    kx1, kx2, kw1, kb1, kw2, kb2 = jax.random.split(key, 6)

    # Deterministic params (mimics PyTorch Linear's small-uniform init),
    # stored as (in, out) so the math is x @ W + b.
    bound1 = 1.0 / (input_sz ** 0.5)
    bound2 = 1.0 / (hsz ** 0.5)
    w1 = jax.random.uniform(kw1, (input_sz, hsz), jnp.float32, -bound1, bound1)
    b1 = jax.random.uniform(kb1, (hsz,), jnp.float32, -bound1, bound1)
    w2 = jax.random.uniform(kw2, (hsz, output_sz), jnp.float32, -bound2, bound2)
    b2 = jax.random.uniform(kb2, (output_sz,), jnp.float32, -bound2, bound2)

    w1p, b1p, w2p, b2p, out_sz = prepare_params(w1, b1, w2, b2)
    params = (w1, b1, w2, b2, w1p, b1p, w2p, b2p)

    _check(8, params, out_sz, kx1)     # tiny batch, single grid step
    _check(520, params, out_sz, kx2)   # multi-step grid + row padding path
    print("KERNEL_OK")
</pallas_src>

<mosaic_0001>
module attributes {stable_mosaic.version = 11 : i64} {
  func.func @_actor_kernel(%arg0: i32, %arg1: memref<8x2xf32, #tpu.memory_space<vmem>>, %arg2: memref<2x128xf32, #tpu.memory_space<vmem>>, %arg3: memref<1x128xf32, #tpu.memory_space<vmem>>, %arg4: memref<128x128xbf16, #tpu.memory_space<vmem>>, %arg5: memref<1x128xf32, #tpu.memory_space<vmem>>, %arg6: memref<8x3xf32, #tpu.memory_space<vmem>>) attributes {dimension_semantics = [#tpu.dimension_semantics<parallel>], iteration_bounds = array<i64: 1>, scalar_prefetch = 0 : i64, scratch_operands = 0 : i64, tpu.core_type = #tpu.core_type<tc>, window_params = [{transform_indices = @transform_0, window_bounds = array<i64: 8, 2>}, {pipeline_mode = #tpu.pipeline_mode<synchronous>, transform_indices = @transform_1, window_bounds = array<i64: 2, 128>}, {pipeline_mode = #tpu.pipeline_mode<synchronous>, transform_indices = @transform_2, window_bounds = array<i64: 1, 128>}, {pipeline_mode = #tpu.pipeline_mode<synchronous>, transform_indices = @transform_3, window_bounds = array<i64: 128, 128>}, {pipeline_mode = #tpu.pipeline_mode<synchronous>, transform_indices = @transform_4, window_bounds = array<i64: 1, 128>}, {transform_indices = @transform_5, window_bounds = array<i64: 8, 3>}]} {
    %c0 = arith.constant 0 : index
    %c0_0 = arith.constant 0 : index
    %0 = vector.load %arg1[%c0, %c0_0] : memref<8x2xf32, #tpu.memory_space<vmem>>, vector<8x2xf32>
    %1 = vector.extract_strided_slice %0 {offsets = [0, 0], sizes = [8, 1], strides = [1, 1]} : vector<8x2xf32> to vector<8x1xf32>
    %c0_1 = arith.constant 0 : index
    %c0_2 = arith.constant 0 : index
    %2 = vector.load %arg2[%c0_1, %c0_2] : memref<2x128xf32, #tpu.memory_space<vmem>>, vector<1x128xf32>
    %3 = vector.broadcast %1 : vector<8x1xf32> to vector<8x128xf32>
    %4 = vector.broadcast %2 : vector<1x128xf32> to vector<8x128xf32>
    %5 = arith.mulf %3, %4 : vector<8x128xf32>
    %6 = vector.extract_strided_slice %0 {offsets = [0, 1], sizes = [8, 1], strides = [1, 1]} : vector<8x2xf32> to vector<8x1xf32>
    %c1 = arith.constant 1 : index
    %c0_3 = arith.constant 0 : index
    %7 = vector.load %arg2[%c1, %c0_3] : memref<2x128xf32, #tpu.memory_space<vmem>>, vector<1x128xf32>
    %8 = vector.broadcast %6 : vector<8x1xf32> to vector<8x128xf32>
    %9 = vector.broadcast %7 : vector<1x128xf32> to vector<8x128xf32>
    %10 = arith.mulf %8, %9 : vector<8x128xf32>
    %11 = arith.addf %5, %10 : vector<8x128xf32>
    %c0_4 = arith.constant 0 : index
    %c0_5 = arith.constant 0 : index
    %12 = vector.load %arg3[%c0_4, %c0_5] : memref<1x128xf32, #tpu.memory_space<vmem>>, vector<1x128xf32>
    %13 = vector.broadcast %12 : vector<1x128xf32> to vector<8x128xf32>
    %14 = arith.addf %11, %13 : vector<8x128xf32>
    %cst = arith.constant 0.000000e+00 : f32
    %15 = vector.broadcast %cst : f32 to vector<8x128xf32>
    %16 = arith.maximumf %14, %15 : vector<8x128xf32>
    %17 = arith.truncf %16 : vector<8x128xf32> to vector<8x128xbf16>
    %c0_6 = arith.constant 0 : index
    %c0_7 = arith.constant 0 : index
    %18 = vector.load %arg4[%c0_6, %c0_7] : memref<128x128xbf16, #tpu.memory_space<vmem>>, vector<128x128xbf16>
    %cst_8 = arith.constant dense<0.000000e+00> : vector<8x128xf32>
    %19 = tpu.matmul %17, %18, %cst_8 {dimension_numbers = #tpu.dot_dimension_numbers<[1], [0], [0], [1], [0, 0, 1, 1], [], []>} : vector<8x128xbf16>, vector<128x128xbf16>, vector<8x128xf32> -> vector<8x128xf32>
    %c0_9 = arith.constant 0 : index
    %c0_10 = arith.constant 0 : index
    %20 = vector.load %arg5[%c0_9, %c0_10] : memref<1x128xf32, #tpu.memory_space<vmem>>, vector<1x128xf32>
    %21 = vector.broadcast %20 : vector<1x128xf32> to vector<8x128xf32>
    %22 = arith.addf %19, %21 : vector<8x128xf32>
    %cst_11 = arith.constant dense<0xFF800000> : vector<8xf32>
    %23 = vector.multi_reduction <maximumf>, %22, %cst_11 [1] : vector<8x128xf32> to vector<8xf32>
    %24 = vector.shape_cast %23 : vector<8xf32> to vector<8x1xf32>
    %25 = vector.broadcast %24 : vector<8x1xf32> to vector<8x128xf32>
    %26 = arith.subf %22, %25 : vector<8x128xf32>
    %27 = math.exp %26 : vector<8x128xf32>
    %cst_12 = arith.constant dense<0.000000e+00> : vector<8xf32>
    %28 = vector.multi_reduction <add>, %27, %cst_12 [1] : vector<8x128xf32> to vector<8xf32>
    %29 = vector.shape_cast %28 : vector<8xf32> to vector<8x1xf32>
    %30 = vector.broadcast %29 : vector<8x1xf32> to vector<8x128xf32>
    %31 = arith.divf %27, %30 : vector<8x128xf32>
    %32 = vector.extract_strided_slice %31 {offsets = [0, 0], sizes = [8, 3], strides = [1, 1]} : vector<8x128xf32> to vector<8x3xf32>
    %c0_13 = arith.constant 0 : index
    %c0_14 = arith.constant 0 : index
    %33 = vector.load %arg6[%c0_13, %c0_14] : memref<8x3xf32, #tpu.memory_space<vmem>>, vector<8x3xf32>
    tpu.vector_store %arg6[%c0_13, %c0_14], %32 {strides = array<i32>} : memref<8x3xf32, #tpu.memory_space<vmem>>, vector<8x3xf32>,
    return
  }
  func.func @transform_0(%arg0: i32) -> (i32, i32) {
    %c0_i32 = arith.constant 0 : i32
    %c0_i32_0 = arith.constant 0 : i32
    return %arg0, %c0_i32 : i32, i32
  }
  func.func @transform_1(%arg0: i32) -> (i32, i32) {
    %c0_i32 = arith.constant 0 : i32
    %c0_i32_0 = arith.constant 0 : i32
    %c0_i32_1 = arith.constant 0 : i32
    return %c0_i32, %c0_i32_0 : i32, i32
  }
  func.func @transform_2(%arg0: i32) -> (i32, i32) {
    %c0_i32 = arith.constant 0 : i32
    %c0_i32_0 = arith.constant 0 : i32
    %c0_i32_1 = arith.constant 0 : i32
    return %c0_i32, %c0_i32_0 : i32, i32
  }
  func.func @transform_3(%arg0: i32) -> (i32, i32) {
    %c0_i32 = arith.constant 0 : i32
    %c0_i32_0 = arith.constant 0 : i32
    %c0_i32_1 = arith.constant 0 : i32
    return %c0_i32, %c0_i32_0 : i32, i32
  }
  func.func @transform_4(%arg0: i32) -> (i32, i32) {
    %c0_i32 = arith.constant 0 : i32
    %c0_i32_0 = arith.constant 0 : i32
    %c0_i32_1 = arith.constant 0 : i32
    return %c0_i32, %c0_i32_0 : i32, i32
  }
  func.func @transform_5(%arg0: i32) -> (i32, i32) {
    %c0_i32 = arith.constant 0 : i32
    %c0_i32_0 = arith.constant 0 : i32
    return %arg0, %c0_i32 : i32, i32
  }
}

</mosaic_0001>

<bundles_post_ra>
// kernel: actor_forward.1
= control target key start
LH: loop header
LB: loop body
LE: loop exit
PB: predicated region body
PF: predicated region fallthrough
CT: control target
= control target key end

     0   :  { %10 = vsyncpa [#allocation3], 0  ;;  %s281_s18 = smov [#allocation2]   ;;  %s348_s0 = inlined_call_operand.vmem [shape: f32[8,2], index: 0, kind: input, shape index: {}]   ;;  %s349_s1 = inlined_call_operand.vmem [shape: f32[2,128], index: 1, kind: input, shape index: {}]   ;;  %s350_s2 = inlined_call_operand.vmem [shape: f32[1,128], index: 2, kind: input, shape index: {}]   ;;  %s351_s3 = inlined_call_operand.hbm [shape: bf16[128,128], index: 3, kind: input, shape index: {}]   ;;  %s352_s4 = inlined_call_operand.vmem [shape: f32[1,128], index: 4, kind: input, shape index: {}]   ;;  %s353_s5 = inlined_call_operand.vmem [shape: f32[8,3], index: 5, kind: output, shape index: {}]  }
   0x1   :  { %s22_s19 = sshll.u32 %s281_s18, 4  ;;  %s257_s22 = scalar_lea.hbm %s351_s3, 1024  ;;  %s23_s19 = int_to_ptr.vmem [resolvable:$true] %s22_s19 }
   0x2   :  { %p258_p0 = scmp.ne.s32.totalorder %s351_s3, %s257_s22  ;;  %p261_p1 = scmp.lt.u32.totalorder %s257_s22, %s351_s3 }
   0x4   :  { %p263_p2 = pnand %p261_p1, %p258_p0 }
   0x6   :  { %266 = shalt.err (!%p263_p2)
}
   0x7   :  { %s267_s27 = scalar_lea.vmem %s23_s19, 1024  ;;  %p272_p4 = scmp.lt.s32.totalorder %s23_s19, %s23_s19 }
   0x8   :  { %p268_p3 = scmp.ne.s32.totalorder %s23_s19, %s267_s27  ;;  %p273_p5 = scmp.lt.s32.totalorder %s267_s27, %s267_s27 }
   0xa   :  { %p274_p6 = por %p273_p5, %p272_p4 }
   0xc   :  { %p275_p7 = pnand %p274_p6, %p268_p3 }
   0xe   :  { %278 = shalt.err (!%p275_p7)
}
   0xf   :  { %s282_s28 = smov 64   ;;  %s283_s29 = smov 4  }
  0x10   :  { %28 = dma.hbm_to_vmem [thread:$0]  %s351_s3, 1024, %s23_s19, [#allocation3], %s282_s28, %s282_s28, %s283_s29  }
  0x11   :  { %279 = dma.done.wait [#allocation3], 1024  }
  0x12   :  { %280 = vsyncadd [#allocation3], 4294966272  ;;  %v284_v0 = vmov 0   ;;  %v285_v1 = vmov 0.0   ;;  %v35_v2 = vld [vmem:[%s348_s0] sm:$0xff]  ;;  %v246_v4 = vld [vmem:[#allocation2 + $0x8] sm:$0xff]  }
  0x13   :  { %243 = vset.pattern.permute.xlu0 %v284_v0  ;;  %216 = vmatprep.subr.bf16.mxu0 %v285_v1  ;;  %v245_v3 = vld [vmem:[#allocation2] sm:$0xff]   ;;  %v286_v5 = vmov 1   ;;  %v247_v6 = vld [vmem:[#allocation2 + $0x10] sm:$0xff]   ;;  %v248_v7 = vld [vmem:[#allocation2 + $0x18] sm:$0xff]   ;;  %vm287_vm0 = vmmov 0   ;;  %vm188_vm1 = vcmask 23552  }
  0x14   :  { %39 = vperm.xlu0 %243, %v35_v2   ;;  %217 = vmatpush3.bf16.msra.mxu0 %v245_v3  ;;  %v249_v8 = vld [vmem:[#allocation2 + $0x20] sm:$0xff]   ;;  %v250_v9 = vld [vmem:[#allocation2 + $0x28] sm:$0xff]   ;;  %v251_v10 = vld [vmem:[#allocation2 + $0x30] sm:$0xff]  }
  0x15   :  { %218 = vmatprep.subr.bf16.mxu0 %v285_v1  ;;  %232 = vmatprep.mubr.msk.bf16.mxu0 %vm287_vm0, %v285_v1  ;;  %v252_v11 = vld [vmem:[#allocation2 + $0x38] sm:$0xff]   ;;  %v195_v13 = vld [vmem:[%s349_s1] ss:$0 sm:$0xff]  ;;  %v196_v14 = vld [vmem:[%s349_s1 + $0x1] ss:$0 sm:$0xff] }
  0x16   :  { %v197_v18 = vld [vmem:[%s350_s2] ss:$0 sm:$0xff] }
  0x17   :  { %v198_v23 = vld [vmem:[%s352_s4] ss:$0 sm:$0xff] }
  0x18   :  { %244 = vset.pattern.permute.xlu0 %v286_v5  ;;  %219 = vmatpush3.bf16.msra.mxu0 %v246_v4 }
  0x19   :  { %49 = vperm.xlu0 %244, %v35_v2   ;;  %220 = vmatprep.subr.bf16.mxu0 %v285_v1 }
  0x1c   :  { %221 = vmatpush3.bf16.msra.mxu0 %v247_v6 }
  0x1d   :  { %222 = vmatprep.subr.bf16.mxu0 %v285_v1 }
  0x20   :  { %223 = vmatpush3.bf16.msra.mxu0 %v248_v7 }
  0x21   :  { %224 = vmatprep.subr.bf16.mxu0 %v285_v1 }
  0x24   :  { %225 = vmatpush3.bf16.msra.mxu0 %v249_v8 }
  0x25   :  { %226 = vmatprep.subr.bf16.mxu0 %v285_v1 }
  0x28   :  { %227 = vmatpush3.bf16.msra.mxu0 %v250_v9 }
  0x29   :  { %228 = vmatprep.subr.bf16.mxu0 %v285_v1 }
  0x2c   :  { %229 = vmatpush3.bf16.msra.mxu0 %v251_v10 }
  0x2d   :  { %230 = vmatprep.subr.bf16.mxu0 %v285_v1 }
  0x30   :  { %231 = vmatpush3.bf16.msra.mxu0 %v252_v11 }
  0x93   :  { %v40_v12 = vpop.permute.xlu0 %39 }
  0x94   :  { %v46_v16 = vmul.f32 %v195_v13, %v40_v12 }
  0x98   :  { %v50_v15 = vpop.permute.xlu0 %49 }
  0x99   :  { %v56_v17 = vmul.f32 %v196_v14, %v50_v15 }
  0x9b   :  { %v57_v19 = vadd.f32 %v56_v17, %v46_v16 }
  0x9d   :  { %v65_v20 = vadd.f32 %v197_v18, %v57_v19 }
  0x9f   :  { %v66_v21 = vmax.f32 %v65_v20, 0.0 }
  0xa1   :  { %v67_v22 = vpack.c.bf16 %v66_v21, %v66_v21 }
  0xa3   :  { %233 = vmatmul.mubr.bf16.vlgmr.msra.gmra.mrb[0].mxu0 %v67_v22 }
 0x176   :  { %v173_v24 = vpop.f32.mrb[0].mxu0 }
 0x177   :  { %v174_v25 = vadd.f32 %v198_v23, %v173_v24  ;;  %v234_v26 = vpop.f32.mrb[1].mxu0 }
 0x178   :  { %v176_v27 = vpop.f32.mrb[2].mxu0 }
 0x179   :  { %179 = vmax.xlane.f32.xlu1 %v174_v25  ;;  %v235_v28 = vpop.f32.mrb[3].mxu0 }
 0x206   :  { %v180_v29 = vpop.xlane.xlu1 %179 }
 0x207   :  { %v181_v30 = vsub.f32 %v174_v25, %v180_v29 }
 0x209   :  { %v182_v31 = vmul.f32 1.442695, %v181_v30 }
 0x20b   :  { %253 = vpow2.f32 %v182_v31 }
 0x215   :  { %v254_v32 = vpop.eup %253 }
 0x216   :  { %184 = vadd.xlane.f32.xlu1 %v254_v32 }
 0x2a3   :  { %v185_v33 = vpop.xlane.xlu1 %184 }
 0x2a4   :  { %255 = vrcp.f32 %v185_v33 }
 0x2ae   :  { %v256_v34 = vpop.eup %255 }
 0x2af   :  { %v187_v35 = vmul.f32 %v256_v34, %v254_v32 }
 0x2b1   :  { %189 = vst.msk [vmem:[%s353_s5] sm:$0xff] %vm188_vm1, %v187_v35 }
 0x2b2   :  { %194 = vsyncpa [#allocation3], 1 }

</bundles_post_ra>
